<compile_context>
chip_gen: v6e
topology: v6e:2x2x1
jax: 0.10.0
libtpu: 0.0.40
codegen_flags: <defaults>
</compile_context>

<pallas_src>
import functools

import jax
import jax.numpy as jnp
from jax.experimental import pallas as pl
from jax.experimental.pallas import tpu as pltpu


# ------------------------------ helpers ------------------------------------

def _round_up(x, m):
    return ((x + m - 1) // m) * m


# ----------------------------- Pallas kernel -------------------------------

def _fused_mlp_kernel(x_ref, w_ref, b_ref, o_ref, *,
                      n_layers, activation, compute_dtype):
    # x_ref: [TILE_M, F]   w_ref: [L, F, F]   b_ref: [L, 1, F]   o_ref: [TILE_M, F]
    h = x_ref[...]
    for l in range(n_layers):                       # static unrolled layer loop
        w = w_ref[l]                                # [F, F], resident in VMEM
        y = jnp.dot(h.astype(compute_dtype), w.astype(compute_dtype),
                    preferred_element_type=jnp.float32)     # MXU, f32 accum
        y = y + b_ref[l]                            # (1, F) broadcasts over rows
        if activation == "relu":
            h = jnp.maximum(y, 0.0)                 # VPU
        else:
            h = jnp.tanh(y)                         # EUP (own VLIW slot)
    o_ref[...] = h.astype(o_ref.dtype)


def mlp_forward(x, params, use_ReLU, *, tile_m=512, compute_dtype=jnp.float32):
    """Fused MLP forward. x:[M, input_dim]; params: list of (w_t:[K,N], b:[N])."""
    activation = "relu" if use_ReLU else "tanh"
    M, input_dim = x.shape
    n_layers = len(params)
    hidden = params[-1][1].shape[0]

    # Lane-dense padded feature width (covers first-layer K and all N).
    F = max(_round_up(input_dim, 128), _round_up(hidden, 128))

    # Batch tiling: TILE_M multiple of 8, grid over padded batch.
    M8 = _round_up(max(M, 8), 8)
    TILE_M = min(tile_m, M8)
    M_pad = _round_up(M8, TILE_M)

    # Zero-pad inputs / stack padded weights & biases.
    x_pad = jnp.zeros((M_pad, F), x.dtype).at[:M, :input_dim].set(x)
    w_stack = jnp.zeros((n_layers, F, F), jnp.float32)
    b_stack = jnp.zeros((n_layers, 1, F), jnp.float32)
    for l, (w_t, b) in enumerate(params):
        k, n = w_t.shape
        w_stack = w_stack.at[l, :k, :n].set(w_t)
        b_stack = b_stack.at[l, 0, :n].set(b)

    kernel = functools.partial(_fused_mlp_kernel,
                               n_layers=n_layers,
                               activation=activation,
                               compute_dtype=compute_dtype)

    out = pl.pallas_call(
        kernel,
        out_shape=jax.ShapeDtypeStruct((M_pad, F), x.dtype),
        grid=(M_pad // TILE_M,),
        in_specs=[
            pl.BlockSpec((TILE_M, F), lambda i: (i, 0)),          # x tile
            pl.BlockSpec((n_layers, F, F), lambda i: (0, 0, 0)),  # weights (resident)
            pl.BlockSpec((n_layers, 1, F), lambda i: (0, 0, 0)),  # biases (resident)
        ],
        out_specs=pl.BlockSpec((TILE_M, F), lambda i: (i, 0)),
        compiler_params=pltpu.CompilerParams(
            dimension_semantics=("parallel",),      # shard batch tiles across TCs
            vmem_limit_bytes=64 << 20),
    )(x_pad, w_stack, b_stack)

    return out[:M, :hidden]


# --------------------------- Parameter creation -----------------------------

def _orthogonal(key, shape, gain):
    # Mirrors torch.nn.init.orthogonal_ semantics for a 2-D weight [out, in].
    out_dim, in_dim = shape
    n_rows, n_cols = (out_dim, in_dim) if out_dim >= in_dim else (in_dim, out_dim)
    a = jax.random.normal(key, (n_rows, n_cols), dtype=jnp.float32)
    q, r = jnp.linalg.qr(a)
    q = q * jnp.sign(jnp.diag(r))
    if out_dim < in_dim:
        q = q.T
    return gain * q[:out_dim, :in_dim]


def _xavier_uniform(key, shape, gain):
    out_dim, in_dim = shape
    limit = gain * jnp.sqrt(6.0 / (in_dim + out_dim))
    return jax.random.uniform(key, shape, jnp.float32, -limit, limit)


def init_mlp_params(key, input_dim, hidden_size, layer_N,
                    use_orthogonal, use_ReLU):
    gain = jnp.sqrt(2.0) if use_ReLU else (5.0 / 3.0)   # nn.init.calculate_gain
    init_fn = _orthogonal if use_orthogonal else _xavier_uniform
    dims = [input_dim] + [hidden_size] * layer_N
    params = []
    for li in range(layer_N):
        key, wk, bk = jax.random.split(key, 3)
        fan_in, fan_out = dims[li], dims[li + 1]
        w = init_fn(wk, (fan_out, fan_in), gain)          # PyTorch [out, in]
        # nn.Linear default bias init (untouched by init_weights):
        bound = 1.0 / jnp.sqrt(fan_in)
        b = jax.random.uniform(bk, (fan_out,), jnp.float32, -bound, bound)
        params.append((w.T, b))                           # store transposed [in, out]
    return params


# ------------------------------ Reference ----------------------------------

def mlp_reference(x, params, use_ReLU):
    act = (lambda v: jnp.maximum(v, 0.0)) if use_ReLU else jnp.tanh
    for w_t, b in params:
        x = act(x @ w_t + b)
    return x


# ---------------------------------- Main -----------------------------------

if __name__ == "__main__":
    input_dim, hidden_size, layer_N = 16, 32, 3
    use_orthogonal, use_ReLU = True, True
    batch = 8

    key = jax.random.PRNGKey(0)
    key, xkey = jax.random.split(key)
    x = jax.random.normal(xkey, (batch, input_dim), dtype=jnp.float32)

    params = init_mlp_params(key, input_dim, hidden_size, layer_N,
                             use_orthogonal, use_ReLU)

    out = mlp_forward(x, params, use_ReLU)
    out = jax.block_until_ready(out)

    ref = mlp_reference(x, params, use_ReLU)
    assert out.shape == (batch, hidden_size)
    assert jnp.allclose(out, ref, atol=1e-5, rtol=1e-5)

    print("KERNEL_OK")
</pallas_src>

<mosaic_0001>
module attributes {stable_mosaic.version = 11 : i64} {
  func.func @_fused_mlp_kernel(%arg0: i32, %arg1: memref<8x128xf32, #tpu.memory_space<vmem>>, %arg2: memref<3x128x128xf32, #tpu.memory_space<vmem>>, %arg3: memref<3x1x128xf32, #tpu.memory_space<vmem>>, %arg4: memref<8x128xf32, #tpu.memory_space<vmem>>) attributes {dimension_semantics = [#tpu.dimension_semantics<parallel>], iteration_bounds = array<i64: 1>, scalar_prefetch = 0 : i64, scratch_operands = 0 : i64, tpu.core_type = #tpu.core_type<tc>, window_params = [{transform_indices = @transform_0, window_bounds = array<i64: 8, 128>}, {pipeline_mode = #tpu.pipeline_mode<synchronous>, transform_indices = @transform_1, window_bounds = array<i64: 3, 128, 128>}, {pipeline_mode = #tpu.pipeline_mode<synchronous>, transform_indices = @transform_2, window_bounds = array<i64: 3, 1, 128>}, {transform_indices = @transform_3, window_bounds = array<i64: 8, 128>}]} {
    %c0 = arith.constant 0 : index
    %c0_0 = arith.constant 0 : index
    %0 = vector.load %arg1[%c0, %c0_0] : memref<8x128xf32, #tpu.memory_space<vmem>>, vector<8x128xf32>
    %c0_1 = arith.constant 0 : index
    %c0_2 = arith.constant 0 : index
    %c0_3 = arith.constant 0 : index
    %1 = vector.load %arg2[%c0_1, %c0_2, %c0_3] : memref<3x128x128xf32, #tpu.memory_space<vmem>>, vector<1x128x128xf32>
    %2 = vector.shape_cast %1 : vector<1x128x128xf32> to vector<128x128xf32>
    %cst = arith.constant dense<0.000000e+00> : vector<8x128xf32>
    %3 = tpu.matmul %0, %2, %cst {dimension_numbers = #tpu.dot_dimension_numbers<[1], [0], [0], [1], [0, 0, 1, 1], [], []>} : vector<8x128xf32>, vector<128x128xf32>, vector<8x128xf32> -> vector<8x128xf32>
    %c0_4 = arith.constant 0 : index
    %c0_5 = arith.constant 0 : index
    %c0_6 = arith.constant 0 : index
    %4 = vector.load %arg3[%c0_4, %c0_5, %c0_6] : memref<3x1x128xf32, #tpu.memory_space<vmem>>, vector<1x1x128xf32>
    %5 = vector.shape_cast %4 : vector<1x1x128xf32> to vector<1x128xf32>
    %6 = vector.broadcast %5 : vector<1x128xf32> to vector<8x128xf32>
    %7 = arith.addf %3, %6 : vector<8x128xf32>
    %cst_7 = arith.constant 0.000000e+00 : f32
    %8 = vector.broadcast %cst_7 : f32 to vector<8x128xf32>
    %9 = arith.maximumf %7, %8 : vector<8x128xf32>
    %c1 = arith.constant 1 : index
    %c0_8 = arith.constant 0 : index
    %c0_9 = arith.constant 0 : index
    %10 = vector.load %arg2[%c1, %c0_8, %c0_9] : memref<3x128x128xf32, #tpu.memory_space<vmem>>, vector<1x128x128xf32>
    %11 = vector.shape_cast %10 : vector<1x128x128xf32> to vector<128x128xf32>
    %cst_10 = arith.constant dense<0.000000e+00> : vector<8x128xf32>
    %12 = tpu.matmul %9, %11, %cst_10 {dimension_numbers = #tpu.dot_dimension_numbers<[1], [0], [0], [1], [0, 0, 1, 1], [], []>} : vector<8x128xf32>, vector<128x128xf32>, vector<8x128xf32> -> vector<8x128xf32>
    %c1_11 = arith.constant 1 : index
    %c0_12 = arith.constant 0 : index
    %c0_13 = arith.constant 0 : index
    %13 = vector.load %arg3[%c1_11, %c0_12, %c0_13] : memref<3x1x128xf32, #tpu.memory_space<vmem>>, vector<1x1x128xf32>
    %14 = vector.shape_cast %13 : vector<1x1x128xf32> to vector<1x128xf32>
    %15 = vector.broadcast %14 : vector<1x128xf32> to vector<8x128xf32>
    %16 = arith.addf %12, %15 : vector<8x128xf32>
    %cst_14 = arith.constant 0.000000e+00 : f32
    %17 = vector.broadcast %cst_14 : f32 to vector<8x128xf32>
    %18 = arith.maximumf %16, %17 : vector<8x128xf32>
    %c2 = arith.constant 2 : index
    %c0_15 = arith.constant 0 : index
    %c0_16 = arith.constant 0 : index
    %19 = vector.load %arg2[%c2, %c0_15, %c0_16] : memref<3x128x128xf32, #tpu.memory_space<vmem>>, vector<1x128x128xf32>
    %20 = vector.shape_cast %19 : vector<1x128x128xf32> to vector<128x128xf32>
    %cst_17 = arith.constant dense<0.000000e+00> : vector<8x128xf32>
    %21 = tpu.matmul %18, %20, %cst_17 {dimension_numbers = #tpu.dot_dimension_numbers<[1], [0], [0], [1], [0, 0, 1, 1], [], []>} : vector<8x128xf32>, vector<128x128xf32>, vector<8x128xf32> -> vector<8x128xf32>
    %c2_18 = arith.constant 2 : index
    %c0_19 = arith.constant 0 : index
    %c0_20 = arith.constant 0 : index
    %22 = vector.load %arg3[%c2_18, %c0_19, %c0_20] : memref<3x1x128xf32, #tpu.memory_space<vmem>>, vector<1x1x128xf32>
    %23 = vector.shape_cast %22 : vector<1x1x128xf32> to vector<1x128xf32>
    %24 = vector.broadcast %23 : vector<1x128xf32> to vector<8x128xf32>
    %25 = arith.addf %21, %24 : vector<8x128xf32>
    %cst_21 = arith.constant 0.000000e+00 : f32
    %26 = vector.broadcast %cst_21 : f32 to vector<8x128xf32>
    %27 = arith.maximumf %25, %26 : vector<8x128xf32>
    %c0_22 = arith.constant 0 : index
    %c0_23 = arith.constant 0 : index
    %28 = vector.load %arg4[%c0_22, %c0_23] : memref<8x128xf32, #tpu.memory_space<vmem>>, vector<8x128xf32>
    tpu.vector_store %arg4[%c0_22, %c0_23], %27 {strides = array<i32>} : memref<8x128xf32, #tpu.memory_space<vmem>>, vector<8x128xf32>,
    return
  }
  func.func @transform_0(%arg0: i32) -> (i32, i32) {
    %c0_i32 = arith.constant 0 : i32
    %c0_i32_0 = arith.constant 0 : i32
    return %arg0, %c0_i32 : i32, i32
  }
  func.func @transform_1(%arg0: i32) -> (i32, i32, i32) {
    %c0_i32 = arith.constant 0 : i32
    %c0_i32_0 = arith.constant 0 : i32
    %c0_i32_1 = arith.constant 0 : i32
    %c0_i32_2 = arith.constant 0 : i32
    return %c0_i32, %c0_i32_0, %c0_i32_1 : i32, i32, i32
  }
  func.func @transform_2(%arg0: i32) -> (i32, i32, i32) {
    %c0_i32 = arith.constant 0 : i32
    %c0_i32_0 = arith.constant 0 : i32
    %c0_i32_1 = arith.constant 0 : i32
    %c0_i32_2 = arith.constant 0 : i32
    return %c0_i32, %c0_i32_0, %c0_i32_1 : i32, i32, i32
  }
  func.func @transform_3(%arg0: i32) -> (i32, i32) {
    %c0_i32 = arith.constant 0 : i32
    %c0_i32_0 = arith.constant 0 : i32
    return %arg0, %c0_i32 : i32, i32
  }
}

</mosaic_0001>

<bundles_post_ra>
// kernel: tpu_custom_call.1
= control target key start
LH: loop header
LB: loop body
LE: loop exit
PB: predicated region body
PF: predicated region fallthrough
CT: control target
= control target key end

     0   :  { %8 = vsyncpa [#allocation3], 0  ;;  %s678_s0 = inlined_call_operand.hbm [shape: f32[8,128], index: 0, kind: input, shape index: {}]   ;;  %s679_s1 = inlined_call_operand.hbm [shape: f32[3,128,128], index: 1, kind: input, shape index: {}]   ;;  %s680_s2 = inlined_call_operand.vmem [shape: f32[3,1,128], index: 2, kind: input, shape index: {}]   ;;  %s681_s3 = inlined_call_operand.hbm [shape: f32[8,128], index: 3, kind: output, shape index: {}]  }
   0x1   :  { %9 = vsyncpa [#allocation6], 0 }
   0x2   :  { %10 = vsyncpa [#allocation4], 0  ;;  %s579_s12 = smov [#allocation2]   ;;  %s580_s14 = smov [#allocation5]  }
   0x3   :  { %s17_s13 = sshll.u32 %s579_s12, 4  ;;  %s26_s15 = sshll.u32 %s580_s14, 4  ;;  %s18_s13 = int_to_ptr.vmem [resolvable:$true] %s17_s13  ;;  %s27_s15 = int_to_ptr.vmem [resolvable:$true] %s26_s15 }
   0x4   :  { %s521_s16 = scalar_lea.vmem %s18_s13, 128  ;;  %p526_p1 = scmp.lt.s32.totalorder %s18_s13, %s18_s13 }
   0x5   :  { %p522_p0 = scmp.ne.s32.totalorder %s18_s13, %s521_s16  ;;  %p527_p2 = scmp.lt.s32.totalorder %s521_s16, %s521_s16 }
   0x7   :  { %p528_p3 = por %p527_p2, %p526_p1 }
   0x9   :  { %p529_p4 = pnand %p528_p3, %p522_p0 }
   0xb   :  { %532 = shalt.err (!%p529_p4)
}
   0xc   :  { %20 = dma.hbm_to_vmem [thread:$0]  %s678_s0, 128, %s18_s13, [#allocation3]  }
   0xd   :  { %s541_s19 = scalar_lea.vmem %s27_s15, 6144  ;;  %p546_p6 = scmp.lt.s32.totalorder %s27_s15, %s27_s15 }
   0xe   :  { %p542_p5 = scmp.ne.s32.totalorder %s27_s15, %s541_s19  ;;  %p547_p7 = scmp.lt.s32.totalorder %s541_s19, %s541_s19 }
  0x10   :  { %p548_p8 = por %p547_p7, %p546_p6 }
  0x12   :  { %p549_p9 = pnand %p548_p8, %p542_p5 }
  0x14   :  { %552 = shalt.err (!%p549_p9)
}
  0x15   :  { %s581_s20 = smov 128   ;;  %s582_s21 = smov 8  }
  0x16   :  { %32 = dma.hbm_to_vmem [thread:$0]  %s679_s1, 6144, %s27_s15, [#allocation6], %s581_s20, %s581_s20, %s582_s21  }
  0x17   :  { %573 = dma.done.wait [#allocation3], 128  }
  0x18   :  { %574 = vsyncadd [#allocation3], 4294967168 }
  0x19   :  { %575 = dma.done.wait [#allocation6], 6144  }
  0x1a   :  { %576 = vsyncadd [#allocation6], 4294961152  ;;  %v583_v0 = vmov 0.0   ;;  %vm584_vm0 = vmmov 0   ;;  %v57_v1 = vld [vmem:[#allocation5 + $0x78] sm:$0xff]  ;;  %v56_v2 = vld [vmem:[#allocation5 + $0x70] sm:$0xff] }
  0x1b   :  { %401 = vmatprep.subr.mxu0 %v583_v0  ;;  %433 = vmatprep.mubr.msk.f32.mxu0 %vm584_vm0, %v583_v0  ;;  %v55_v3 = vld [vmem:[#allocation5 + $0x68] sm:$0xff]  ;;  %v54_v4 = vld [vmem:[#allocation5 + $0x60] sm:$0xff]  ;;  %v152_v5 = vld [vmem:[#allocation5 + $0xf8] sm:$0xff]  ;;  %s585_s28 = smov [#allocation7]  }
  0x1c   :  { %436 = vmatprep.subr.mxu1 %v583_v0  ;;  %468 = vmatprep.mubr.msk.f32.mxu1 %vm584_vm0, %v583_v0  ;;  %v53_v6 = vld [vmem:[#allocation5 + $0x58] sm:$0xff]  ;;  %v151_v7 = vld [vmem:[#allocation5 + $0xf0] sm:$0xff]  ;;  %v150_v8 = vld [vmem:[#allocation5 + $0xe8] sm:$0xff]  ;;  %s335_s29 = sshll.u32 %s585_s28, 4  ;;  %s336_s29 = int_to_ptr.vmem [resolvable:$true] %s335_s29 }
  0x1d   :  { %402 = vmatpush3.msra.mxu0 %v57_v1  ;;  %437 = vmatpush3.msra.mxu1 %v152_v5  ;;  %v52_v9 = vld [vmem:[#allocation5 + $0x50] sm:$0xff]  ;;  %v149_v10 = vld [vmem:[#allocation5 + $0xe0] sm:$0xff]  ;;  %v51_v11 = vld [vmem:[#allocation5 + $0x48] sm:$0xff]  ;;  %s553_s30 = scalar_lea.vmem %s336_s29, 128  ;;  %p558_p11 = scmp.lt.s32.totalorder %s336_s29, %s336_s29 }
  0x1e   :  { %403 = vmatprep.subr.mxu0 %v583_v0  ;;  %438 = vmatprep.subr.mxu1 %v583_v0  ;;  %v148_v12 = vld [vmem:[#allocation5 + $0xd8] sm:$0xff]  ;;  %v50_v13 = vld [vmem:[#allocation5 + $0x40] sm:$0xff]  ;;  %v147_v14 = vld [vmem:[#allocation5 + $0xd0] sm:$0xff]  ;;  %p554_p10 = scmp.ne.s32.totalorder %s336_s29, %s553_s30  ;;  %p559_p12 = scmp.lt.s32.totalorder %s553_s30, %s553_s30 }
  0x1f   :  { %404 = vmatpush3.msra.mxu0 %v56_v2  ;;  %439 = vmatpush3.msra.mxu1 %v151_v7  ;;  %v49_v15 = vld [vmem:[#allocation5 + $0x38] sm:$0xff]  ;;  %v146_v16 = vld [vmem:[#allocation5 + $0xc8] sm:$0xff]  ;;  %v48_v17 = vld [vmem:[#allocation5 + $0x30] sm:$0xff] }
  0x20   :  { %405 = vmatprep.subr.mxu0 %v583_v0  ;;  %440 = vmatprep.subr.mxu1 %v583_v0  ;;  %v145_v18 = vld [vmem:[#allocation5 + $0xc0] sm:$0xff]  ;;  %v47_v19 = vld [vmem:[#allocation5 + $0x28] sm:$0xff]  ;;  %v144_v20 = vld [vmem:[#allocation5 + $0xb8] sm:$0xff]  ;;  %p560_p13 = por %p559_p12, %p558_p11 }
  0x21   :  { %406 = vmatpush3.msra.mxu0 %v55_v3  ;;  %441 = vmatpush3.msra.mxu1 %v150_v8  ;;  %v46_v21 = vld [vmem:[#allocation5 + $0x20] sm:$0xff]  ;;  %v143_v22 = vld [vmem:[#allocation5 + $0xb0] sm:$0xff]  ;;  %v45_v23 = vld [vmem:[#allocation5 + $0x18] sm:$0xff] }
  0x22   :  { %407 = vmatprep.subr.mxu0 %v583_v0  ;;  %442 = vmatprep.subr.mxu1 %v583_v0  ;;  %v142_v24 = vld [vmem:[#allocation5 + $0xa8] sm:$0xff]  ;;  %v44_v25 = vld [vmem:[#allocation5 + $0x10] sm:$0xff]  ;;  %v141_v26 = vld [vmem:[#allocation5 + $0xa0] sm:$0xff]  ;;  %p561_p0 = pnand %p560_p13, %p554_p10 }
  0x23   :  { %408 = vmatpush3.msra.mxu0 %v54_v4  ;;  %443 = vmatpush3.msra.mxu1 %v149_v10  ;;  %v43_v27 = vld [vmem:[#allocation5 + $0x8] sm:$0xff]  ;;  %v140_v28 = vld [vmem:[#allocation5 + $0x98] sm:$0xff]  ;;  %v42_v29 = vld [vmem:[#allocation5] sm:$0xff] }
  0x24   :  { %409 = vmatprep.subr.mxu0 %v583_v0  ;;  %444 = vmatprep.subr.mxu1 %v583_v0  ;;  %v41_v30 = vld [vmem:[#allocation2] sm:$0xff]  ;;  %v139_v31 = vld [vmem:[#allocation5 + $0x90] sm:$0xff]  ;;  %v138_v32 = vld [vmem:[#allocation5 + $0x88] sm:$0xff] }
  0x25   :  { %410 = vmatpush3.msra.mxu0 %v53_v6  ;;  %445 = vmatpush3.msra.mxu1 %v148_v12  ;;  %v137_v33 = vld [vmem:[#allocation5 + $0x80] sm:$0xff]  ;;  %v248_v34 = vld [vmem:[#allocation5 + $0x178] sm:$0xff]  ;;  %v247_v35 = vld [vmem:[#allocation5 + $0x170] sm:$0xff] }
  0x26   :  { %411 = vmatprep.subr.mxu0 %v583_v0  ;;  %446 = vmatprep.subr.mxu1 %v583_v0  ;;  %v246_v36 = vld [vmem:[#allocation5 + $0x168] sm:$0xff]  ;;  %v245_v37 = vld [vmem:[#allocation5 + $0x160] sm:$0xff]  ;;  %v244_v38 = vld [vmem:[#allocation5 + $0x158] sm:$0xff] }
  0x27   :  { %412 = vmatpush3.msra.mxu0 %v52_v9  ;;  %447 = vmatpush3.msra.mxu1 %v147_v14  ;;  %v243_v39 = vld [vmem:[#allocation5 + $0x150] sm:$0xff]  ;;  %v242_v40 = vld [vmem:[#allocation5 + $0x148] sm:$0xff]  ;;  %v241_v41 = vld [vmem:[#allocation5 + $0x140] sm:$0xff] }
  0x28   :  { %413 = vmatprep.subr.mxu0 %v583_v0  ;;  %448 = vmatprep.subr.mxu1 %v583_v0  ;;  %v240_v42 = vld [vmem:[#allocation5 + $0x138] sm:$0xff]  ;;  %v239_v43 = vld [vmem:[#allocation5 + $0x130] sm:$0xff]  ;;  %v238_v44 = vld [vmem:[#allocation5 + $0x128] sm:$0xff] }
  0x29   :  { %414 = vmatpush3.msra.mxu0 %v51_v11  ;;  %449 = vmatpush3.msra.mxu1 %v146_v16  ;;  %v237_v45 = vld [vmem:[#allocation5 + $0x120] sm:$0xff]  ;;  %v236_v46 = vld [vmem:[#allocation5 + $0x118] sm:$0xff]  ;;  %v235_v52 = vld [vmem:[#allocation5 + $0x110] sm:$0xff] }
  0x2a   :  { %415 = vmatprep.subr.mxu0 %v583_v0  ;;  %450 = vmatprep.subr.mxu1 %v583_v0  ;;  %v345_v47 = vld [vmem:[%s680_s2] ss:$0 sm:$0xff]  ;;  %v234_v53 = vld [vmem:[#allocation5 + $0x108] sm:$0xff]  ;;  %v233_v54 = vld [vmem:[#allocation5 + $0x100] sm:$0xff] }
  0x2b   :  { %416 = vmatpush3.msra.mxu0 %v50_v13  ;;  %451 = vmatpush3.msra.mxu1 %v145_v18  ;;  %v347_v55 = vld [vmem:[%s680_s2 + $0x1] ss:$0 sm:$0xff]  ;;  %v349_v60 = vld [vmem:[%s680_s2 + $0x2] ss:$0 sm:$0xff] }
  0x2c   :  { %417 = vmatprep.subr.mxu0 %v583_v0  ;;  %452 = vmatprep.subr.mxu1 %v583_v0 }
  0x2d   :  { %418 = vmatpush3.msra.mxu0 %v49_v15  ;;  %453 = vmatpush3.msra.mxu1 %v144_v20 }
  0x2e   :  { %419 = vmatprep.subr.mxu0 %v583_v0  ;;  %454 = vmatprep.subr.mxu1 %v583_v0 }
  0x2f   :  { %420 = vmatpush3.msra.mxu0 %v48_v17  ;;  %455 = vmatpush3.msra.mxu1 %v143_v22 }
  0x30   :  { %421 = vmatprep.subr.mxu0 %v583_v0  ;;  %456 = vmatprep.subr.mxu1 %v583_v0 }
  0x31   :  { %422 = vmatpush3.msra.mxu0 %v47_v19  ;;  %457 = vmatpush3.msra.mxu1 %v142_v24 }
  0x32   :  { %423 = vmatprep.subr.mxu0 %v583_v0  ;;  %458 = vmatprep.subr.mxu1 %v583_v0 }
  0x33   :  { %424 = vmatpush3.msra.mxu0 %v46_v21  ;;  %459 = vmatpush3.msra.mxu1 %v141_v26 }
  0x34   :  { %425 = vmatprep.subr.mxu0 %v583_v0  ;;  %460 = vmatprep.subr.mxu1 %v583_v0 }
  0x35   :  { %426 = vmatpush3.msra.mxu0 %v45_v23  ;;  %461 = vmatpush3.msra.mxu1 %v140_v28 }
  0x36   :  { %427 = vmatprep.subr.mxu0 %v583_v0  ;;  %462 = vmatprep.subr.mxu1 %v583_v0 }
  0x37   :  { %428 = vmatpush3.msra.mxu0 %v44_v25  ;;  %463 = vmatpush3.msra.mxu1 %v139_v31 }
  0x38   :  { %429 = vmatprep.subr.mxu0 %v583_v0  ;;  %464 = vmatprep.subr.mxu1 %v583_v0 }
  0x39   :  { %430 = vmatpush3.msra.mxu0 %v43_v27  ;;  %465 = vmatpush3.msra.mxu1 %v138_v32 }
  0x3a   :  { %431 = vmatprep.subr.mxu0 %v583_v0  ;;  %466 = vmatprep.subr.mxu1 %v583_v0 }
  0x3b   :  { %432 = vmatpush3.msra.mxu0 %v42_v29  ;;  %467 = vmatpush3.msra.mxu1 %v137_v33 }
  0x3c   :  { %434 = vmatmul.mubr.f32.vlgmr.msra.gmra.mxu0 %v41_v30  ;;  %471 = vmatprep.subr.mxu0 %v583_v0 }
  0x3d   :  { %503 = vmatprep.mubr.msk.f32.mxu0 %vm584_vm0, %v583_v0  ;;  %472 = vmatpush3.msra.mxu0 %v248_v34 }
  0x3e   :  { %473 = vmatprep.subr.mxu0 %v583_v0 }
  0x3f   :  { %474 = vmatpush3.msra.mxu0 %v247_v35 }
  0x40   :  { %475 = vmatprep.subr.mxu0 %v583_v0 }
  0x41   :  { %476 = vmatpush3.msra.mxu0 %v246_v36 }
  0x42   :  { %477 = vmatprep.subr.mxu0 %v583_v0 }
  0x43   :  { %478 = vmatpush3.msra.mxu0 %v245_v37 }
  0x44   :  { %479 = vmatprep.subr.mxu0 %v583_v0 }
  0x45   :  { %480 = vmatpush3.msra.mxu0 %v244_v38 }
  0x46   :  { %481 = vmatprep.subr.mxu0 %v583_v0 }
  0x47   :  { %482 = vmatpush3.msra.mxu0 %v243_v39 }
  0x48   :  { %483 = vmatprep.subr.mxu0 %v583_v0 }
  0x49   :  { %484 = vmatpush3.msra.mxu0 %v242_v40 }
  0x4a   :  { %485 = vmatprep.subr.mxu0 %v583_v0 }
  0x4b   :  { %486 = vmatpush3.msra.mxu0 %v241_v41 }
  0x4c   :  { %487 = vmatprep.subr.mxu0 %v583_v0 }
  0x4d   :  { %488 = vmatpush3.msra.mxu0 %v240_v42 }
  0x4e   :  { %489 = vmatprep.subr.mxu0 %v583_v0 }
  0x4f   :  { %490 = vmatpush3.msra.mxu0 %v239_v43 }
  0x50   :  { %491 = vmatprep.subr.mxu0 %v583_v0 }
  0x51   :  { %492 = vmatpush3.msra.mxu0 %v238_v44 }
  0x52   :  { %493 = vmatprep.subr.mxu0 %v583_v0 }
  0x53   :  { %494 = vmatpush3.msra.mxu0 %v237_v45 }
  0x54   :  { %495 = vmatprep.subr.mxu0 %v583_v0 }
  0x55   :  { %496 = vmatpush3.msra.mxu0 %v236_v46 }
  0x56   :  { %497 = vmatprep.subr.mxu0 %v583_v0 }
  0x57   :  { %498 = vmatpush3.msra.mxu0 %v235_v52 }
  0x58   :  { %499 = vmatprep.subr.mxu0 %v583_v0 }
  0x59   :  { %500 = vmatpush3.msra.mxu0 %v234_v53 }
  0x5a   :  { %501 = vmatprep.subr.mxu0 %v583_v0 }
  0x5b   :  { %502 = vmatpush3.msra.mxu0 %v233_v54 }
  0xfc   :  { %v131_v48 = vpop.f32.mrf.mxu0 }
  0xfd   :  { %v132_v49 = vadd.f32 %v345_v47, %v131_v48 }
  0xfe   :  { %v435_v50 = vpop.f32.mrf.mxu0 }
  0xff   :  { %v135_v51 = vmax.f32 %v132_v49, 0.0 }
 0x101   :  { %469 = vmatmul.mubr.f32.vlgmr.msra.gmra.mxu1 %v135_v51 }
 0x1c1   :  { %v227_v56 = vpop.f32.mrf.mxu1 }
 0x1c2   :  { %v228_v57 = vadd.f32 %v347_v55, %v227_v56 }
 0x1c3   :  { %v470_v58 = vpop.f32.mrf.mxu1 }
 0x1c4   :  { %v231_v59 = vmax.f32 %v228_v57, 0.0 }
 0x1c6   :  { %504 = vmatmul.mubr.f32.vlgmr.msra.gmra.mxu0 %v231_v59 }
 0x286   :  { %v323_v61 = vpop.f32.mrf.mxu0 }
 0x287   :  { %v324_v62 = vadd.f32 %v349_v60, %v323_v61 }
 0x288   :  { %v505_v63 = vpop.f32.mrf.mxu0 }
 0x289   :  { %v327_v0 = vmax.f32 %v324_v62, 0.0 }
 0x28b   :  { %328 = vst [vmem:[#allocation7] sm:$0xff] %v327_v0 }
 0x28c   :  { %564 = shalt.err (!%p561_p0)
}
 0x28d   :  { %338 = dma.vmem_to_hbm [thread:$0]  %s336_s29, 128, %s681_s3, [#allocation4]  }
 0x28e   :  { %577 = dma.done.wait [#allocation4], 128  }
 0x28f   :  { %578 = vsyncadd [#allocation4], 4294967168 }
 0x290   :  { %342 = vsyncpa [#allocation3], 1 }
 0x291   :  { %343 = vsyncpa [#allocation6], 1 }
 0x292   :  { %344 = vsyncpa [#allocation4], 1 }

</bundles_post_ra>
